<compile_context>
chip_gen: v7x
topology: tpu7x:2x2x1
jax: 0.10.0
libtpu: 0.0.40
codegen_flags: <defaults>
</compile_context>

<pallas_src>
import functools

import jax
import jax.numpy as jnp
from jax.experimental import pallas as pl
from jax.experimental.pallas import tpu as pltpu


def _conv1x1_hswish_pad_kernel(x_ref, w_ref, o_ref, *, cin, cout):
    # x_ref: (Cin, H, W)        f32 VMEM -- channels major, H on sublanes, W on lanes
    # w_ref: (Cout*Cin,)        f32 SMEM -- flattened 1x1-conv weights (scalar reads)
    # o_ref: (Cout, H+2, W+2)   f32 VMEM -- zero border folded into the kernel output
    H = x_ref.shape[1]
    W = x_ref.shape[2]

    # Zero the whole padded block once (border stays 0; interior overwritten below).
    o_ref[...] = jnp.zeros_like(o_ref)

    x = x_ref[...]                                   # (Cin, H, W)

    # 1x1 conv as Cout*Cin scalar*plane FMAs on the VPU.  Indexing x along the
    # leading (major) dim selects whole vreg planes -- no sublane/lane relayout.
    planes = []
    for co in range(cout):
        acc = w_ref[co * cin + 0] * x[0]             # (H, W)
        for ci in range(1, cin):
            acc = acc + w_ref[co * cin + ci] * x[ci]
        planes.append(acc)
    t1 = jnp.stack(planes, axis=0) if cout > 1 else planes[0][None]   # (Cout, H, W)

    # hard-swish: t1 * clamp(t1 + 3, 0, 6) / 6
    t6 = t1 * jnp.clip(t1 + 3.0, 0.0, 6.0) * (1.0 / 6.0)

    # Single interior-slice store; the zero ring written above is the conv padding.
    o_ref[:, 1:H + 1, 1:W + 1] = t6


def conv1x1_hardswish(x_nchw, weight_oikk):
    """x_nchw: (N, Cin, H, W) f32.  weight_oikk: (Cout, Cin, 1, 1) f32.

    Returns (N, Cout, H+2, W+2, 1) f32, matching
    F.conv2d(x, W, padding=1, bias=None) followed by x*clamp(x+3,0,6)/6, unsqueeze(-1).
    """
    N, Cin, H, W = x_nchw.shape
    Cout = weight_oikk.shape[0]
    assert weight_oikk.shape == (Cout, Cin, 1, 1)

    x4d = x_nchw.astype(jnp.float32)
    w1d = weight_oikk.reshape(Cout * Cin).astype(jnp.float32)   # 1-D SMEM table

    kernel = functools.partial(_conv1x1_hswish_pad_kernel, cin=Cin, cout=Cout)

    cost = pl.CostEstimate(
        flops=2 * N * Cout * Cin * H * W,
        transcendentals=0,
        bytes_accessed=4 * N * (Cin * H * W + Cout * (H + 2) * (W + 2)),
    )

    out4d = pl.pallas_call(
        kernel,
        out_shape=jax.ShapeDtypeStruct((N, Cout, H + 2, W + 2), jnp.float32),
        grid=(N,),
        in_specs=[
            pl.BlockSpec((None, Cin, H, W), lambda n: (n, 0, 0, 0)),        # VMEM image
            pl.BlockSpec(memory_space=pltpu.MemorySpace.SMEM),              # SMEM weights
        ],
        out_specs=pl.BlockSpec((None, Cout, H + 2, W + 2), lambda n: (n, 0, 0, 0)),
        compiler_params=pltpu.CompilerParams(
            dimension_semantics=("parallel",)),   # batch axis; shards across TCs if N>1
        cost_estimate=cost,
    )(x4d, w1d)

    # unsqueeze(-1) is a free host-side reshape.
    return out4d[..., None]


if __name__ == "__main__":
    key = jax.random.PRNGKey(0)
    kx, kw = jax.random.split(key)

    # Shapes implied by the module: x1 = randn(1, 3, 28, 28), W = randn(3, 3, 1, 1)
    x1 = jax.random.normal(kx, (1, 3, 28, 28), jnp.float32)
    weight = jax.random.normal(kw, (3, 3, 1, 1), jnp.float32)

    out = conv1x1_hardswish(x1, weight)
    out = jax.block_until_ready(out)

    assert out.shape == (1, 3, 30, 30, 1), out.shape
    assert out.dtype == jnp.float32

    # Pure-JAX reference for the module's forward pass.
    w2 = weight[:, :, 0, 0]                                   # (Cout, Cin)
    t1 = jnp.einsum("oc,nchw->nohw", w2, x1)
    t1 = jnp.pad(t1, ((0, 0), (0, 0), (1, 1), (1, 1)))        # conv2d padding=1, bias=None
    ref = (t1 * jnp.clip(t1 + 3.0, 0.0, 6.0) / 6.0)[..., None]
    assert jnp.allclose(out, ref, atol=1e-4, rtol=1e-4), float(
        jnp.max(jnp.abs(out - ref)))

    print("KERNEL_OK")
</pallas_src>

<mosaic_0001>
module attributes {stable_mosaic.version = 11 : i64} {
  func.func @_conv1x1_hswish_pad_kernel(%arg0: i32, %arg1: memref<1x3x28x28xf32, #tpu.memory_space<vmem>>, %arg2: memref<9xf32, #tpu.memory_space<smem>>, %arg3: memref<1x3x30x30xf32, #tpu.memory_space<vmem>>) attributes {dimension_semantics = [#tpu.dimension_semantics<parallel>], iteration_bounds = array<i64: 1>, scalar_prefetch = 0 : i64, scratch_operands = 0 : i64, tpu.core_type = #tpu.core_type<tc>, window_params = [{transform_indices = @transform_0, window_bounds = array<i64: 1, 3, 28, 28>}, {transform_indices = @transform_1, window_bounds = array<i64: 9>}, {transform_indices = @transform_2, window_bounds = array<i64: 1, 3, 30, 30>}]} {
    %cst = arith.constant 0.000000e+00 : f32
    %0 = vector.broadcast %cst : f32 to vector<3x30x30xf32>
    %c0 = arith.constant 0 : index
    %c0_0 = arith.constant 0 : index
    %c0_1 = arith.constant 0 : index
    %c0_2 = arith.constant 0 : index
    %1 = vector.load %arg3[%c0, %c0_0, %c0_1, %c0_2] : memref<1x3x30x30xf32, #tpu.memory_space<vmem>>, vector<1x3x30x30xf32>
    %2 = vector.shape_cast %1 : vector<1x3x30x30xf32> to vector<3x30x30xf32>
    %3 = vector.shape_cast %0 : vector<3x30x30xf32> to vector<1x3x30x30xf32>
    tpu.vector_store %arg3[%c0, %c0_0, %c0_1, %c0_2], %3 {strides = array<i32>} : memref<1x3x30x30xf32, #tpu.memory_space<vmem>>, vector<1x3x30x30xf32>,
    %c0_3 = arith.constant 0 : index
    %c0_4 = arith.constant 0 : index
    %c0_5 = arith.constant 0 : index
    %c0_6 = arith.constant 0 : index
    %4 = vector.load %arg1[%c0_3, %c0_4, %c0_5, %c0_6] : memref<1x3x28x28xf32, #tpu.memory_space<vmem>>, vector<1x3x28x28xf32>
    %5 = vector.shape_cast %4 : vector<1x3x28x28xf32> to vector<3x28x28xf32>
    %c0_7 = arith.constant 0 : index
    %6 = memref.load %arg2[%c0_7] : memref<9xf32, #tpu.memory_space<smem>>
    %7 = vector.extract_strided_slice %5 {offsets = [0, 0, 0], sizes = [1, 28, 28], strides = [1, 1, 1]} : vector<3x28x28xf32> to vector<1x28x28xf32>
    %8 = vector.shape_cast %7 : vector<1x28x28xf32> to vector<28x28xf32>
    %9 = vector.broadcast %6 : f32 to vector<28x28xf32>
    %10 = arith.mulf %9, %8 : vector<28x28xf32>
    %c1 = arith.constant 1 : index
    %11 = memref.load %arg2[%c1] : memref<9xf32, #tpu.memory_space<smem>>
    %12 = vector.extract_strided_slice %5 {offsets = [1, 0, 0], sizes = [1, 28, 28], strides = [1, 1, 1]} : vector<3x28x28xf32> to vector<1x28x28xf32>
    %13 = vector.shape_cast %12 : vector<1x28x28xf32> to vector<28x28xf32>
    %14 = vector.broadcast %11 : f32 to vector<28x28xf32>
    %15 = arith.mulf %14, %13 : vector<28x28xf32>
    %16 = arith.addf %10, %15 : vector<28x28xf32>
    %c2 = arith.constant 2 : index
    %17 = memref.load %arg2[%c2] : memref<9xf32, #tpu.memory_space<smem>>
    %18 = vector.extract_strided_slice %5 {offsets = [2, 0, 0], sizes = [1, 28, 28], strides = [1, 1, 1]} : vector<3x28x28xf32> to vector<1x28x28xf32>
    %19 = vector.shape_cast %18 : vector<1x28x28xf32> to vector<28x28xf32>
    %20 = vector.broadcast %17 : f32 to vector<28x28xf32>
    %21 = arith.mulf %20, %19 : vector<28x28xf32>
    %22 = arith.addf %16, %21 : vector<28x28xf32>
    %c3 = arith.constant 3 : index
    %23 = memref.load %arg2[%c3] : memref<9xf32, #tpu.memory_space<smem>>
    %24 = vector.extract_strided_slice %5 {offsets = [0, 0, 0], sizes = [1, 28, 28], strides = [1, 1, 1]} : vector<3x28x28xf32> to vector<1x28x28xf32>
    %25 = vector.shape_cast %24 : vector<1x28x28xf32> to vector<28x28xf32>
    %26 = vector.broadcast %23 : f32 to vector<28x28xf32>
    %27 = arith.mulf %26, %25 : vector<28x28xf32>
    %c4 = arith.constant 4 : index
    %28 = memref.load %arg2[%c4] : memref<9xf32, #tpu.memory_space<smem>>
    %29 = vector.extract_strided_slice %5 {offsets = [1, 0, 0], sizes = [1, 28, 28], strides = [1, 1, 1]} : vector<3x28x28xf32> to vector<1x28x28xf32>
    %30 = vector.shape_cast %29 : vector<1x28x28xf32> to vector<28x28xf32>
    %31 = vector.broadcast %28 : f32 to vector<28x28xf32>
    %32 = arith.mulf %31, %30 : vector<28x28xf32>
    %33 = arith.addf %27, %32 : vector<28x28xf32>
    %c5 = arith.constant 5 : index
    %34 = memref.load %arg2[%c5] : memref<9xf32, #tpu.memory_space<smem>>
    %35 = vector.extract_strided_slice %5 {offsets = [2, 0, 0], sizes = [1, 28, 28], strides = [1, 1, 1]} : vector<3x28x28xf32> to vector<1x28x28xf32>
    %36 = vector.shape_cast %35 : vector<1x28x28xf32> to vector<28x28xf32>
    %37 = vector.broadcast %34 : f32 to vector<28x28xf32>
    %38 = arith.mulf %37, %36 : vector<28x28xf32>
    %39 = arith.addf %33, %38 : vector<28x28xf32>
    %c6 = arith.constant 6 : index
    %40 = memref.load %arg2[%c6] : memref<9xf32, #tpu.memory_space<smem>>
    %41 = vector.extract_strided_slice %5 {offsets = [0, 0, 0], sizes = [1, 28, 28], strides = [1, 1, 1]} : vector<3x28x28xf32> to vector<1x28x28xf32>
    %42 = vector.shape_cast %41 : vector<1x28x28xf32> to vector<28x28xf32>
    %43 = vector.broadcast %40 : f32 to vector<28x28xf32>
    %44 = arith.mulf %43, %42 : vector<28x28xf32>
    %c7 = arith.constant 7 : index
    %45 = memref.load %arg2[%c7] : memref<9xf32, #tpu.memory_space<smem>>
    %46 = vector.extract_strided_slice %5 {offsets = [1, 0, 0], sizes = [1, 28, 28], strides = [1, 1, 1]} : vector<3x28x28xf32> to vector<1x28x28xf32>
    %47 = vector.shape_cast %46 : vector<1x28x28xf32> to vector<28x28xf32>
    %48 = vector.broadcast %45 : f32 to vector<28x28xf32>
    %49 = arith.mulf %48, %47 : vector<28x28xf32>
    %50 = arith.addf %44, %49 : vector<28x28xf32>
    %c8 = arith.constant 8 : index
    %51 = memref.load %arg2[%c8] : memref<9xf32, #tpu.memory_space<smem>>
    %52 = vector.extract_strided_slice %5 {offsets = [2, 0, 0], sizes = [1, 28, 28], strides = [1, 1, 1]} : vector<3x28x28xf32> to vector<1x28x28xf32>
    %53 = vector.shape_cast %52 : vector<1x28x28xf32> to vector<28x28xf32>
    %54 = vector.broadcast %51 : f32 to vector<28x28xf32>
    %55 = arith.mulf %54, %53 : vector<28x28xf32>
    %56 = arith.addf %50, %55 : vector<28x28xf32>
    %57 = vector.shape_cast %22 : vector<28x28xf32> to vector<1x28x28xf32>
    %58 = vector.shape_cast %39 : vector<28x28xf32> to vector<1x28x28xf32>
    %59 = vector.shape_cast %56 : vector<28x28xf32> to vector<1x28x28xf32>
    %60 = tpu.concatenate %57, %58, %59 in 0 : vector<1x28x28xf32>, vector<1x28x28xf32>, vector<1x28x28xf32> -> vector<3x28x28xf32>
    %cst_8 = arith.constant 3.000000e+00 : f32
    %61 = vector.broadcast %cst_8 : f32 to vector<3x28x28xf32>
    %62 = arith.addf %60, %61 : vector<3x28x28xf32>
    %cst_9 = arith.constant 0.000000e+00 : f32
    %cst_10 = arith.constant 6.000000e+00 : f32
    %63 = vector.broadcast %cst_9 : f32 to vector<3x28x28xf32>
    %64 = arith.maximumf %63, %62 : vector<3x28x28xf32>
    %65 = vector.broadcast %cst_10 : f32 to vector<3x28x28xf32>
    %66 = arith.minimumf %65, %64 : vector<3x28x28xf32>
    %67 = arith.mulf %60, %66 : vector<3x28x28xf32>
    %cst_11 = arith.constant 0.166666672 : f32
    %68 = vector.broadcast %cst_11 : f32 to vector<3x28x28xf32>
    %69 = arith.mulf %67, %68 : vector<3x28x28xf32>
    %c0_12 = arith.constant 0 : index
    %c0_13 = arith.constant 0 : index
    %c1_14 = arith.constant 1 : index
    %c1_15 = arith.constant 1 : index
    %70 = vector.load %arg3[%c0_12, %c0_13, %c1_14, %c1_15] : memref<1x3x30x30xf32, #tpu.memory_space<vmem>>, vector<1x3x28x28xf32>
    %71 = vector.shape_cast %70 : vector<1x3x28x28xf32> to vector<3x28x28xf32>
    %72 = vector.shape_cast %69 : vector<3x28x28xf32> to vector<1x3x28x28xf32>
    tpu.vector_store %arg3[%c0_12, %c0_13, %c1_14, %c1_15], %72 {strides = array<i32>} : memref<1x3x30x30xf32, #tpu.memory_space<vmem>>, vector<1x3x28x28xf32>,
    return
  }
  func.func @transform_0(%arg0: i32) -> (i32, i32, i32, i32) {
    %c0_i32 = arith.constant 0 : i32
    %c0_i32_0 = arith.constant 0 : i32
    %c0_i32_1 = arith.constant 0 : i32
    %c0_i32_2 = arith.constant 0 : i32
    return %arg0, %c0_i32, %c0_i32_0, %c0_i32_1 : i32, i32, i32, i32
  }
  func.func @transform_1(%arg0: i32) -> i32 {
    %c0_i32 = arith.constant 0 : i32
    %c0_i32_0 = arith.constant 0 : i32
    return %c0_i32 : i32
  }
  func.func @transform_2(%arg0: i32) -> (i32, i32, i32, i32) {
    %c0_i32 = arith.constant 0 : i32
    %c0_i32_0 = arith.constant 0 : i32
    %c0_i32_1 = arith.constant 0 : i32
    %c0_i32_2 = arith.constant 0 : i32
    return %arg0, %c0_i32, %c0_i32_0, %c0_i32_1 : i32, i32, i32, i32
  }
}

</mosaic_0001>

<bundles_post_ra>
// kernel: tpu_custom_call.1
= control target key start
LH: loop header
LB: loop body
LE: loop exit
PB: predicated region body
PF: predicated region fallthrough
CT: control target
= control target key end

     0   :  { %7 = vsyncpa [#allocation3], 0  ;;  %s505_s0 = inlined_call_operand.vmem [shape: f32[1,3,28,28], index: 0, kind: input, shape index: {}]   ;;  %s506_s1 = inlined_call_operand.vmem [shape: f32[9], index: 1, kind: input, shape index: {}]   ;;  %s507_s2 = inlined_call_operand.vmem [shape: f32[1,3,30,30], index: 2, kind: output, shape index: {}]  }
   0x1   :  { %s16_s11 = sshll.u32 %s506_s1, 4  ;;  %s17_s11 = int_to_ptr.vmem [resolvable:$true] %s16_s11 }
   0x2   :  { %s266_s12 = scalar_lea.vmem %s17_s11, 16  ;;  %p271_p1 = scmp.lt.s32.totalorder %s17_s11, %s17_s11 }
   0x3   :  { %p267_p0 = scmp.ne.s32.totalorder %s17_s11, %s266_s12  ;;  %p272_p2 = scmp.lt.s32.totalorder %s266_s12, %s266_s12 }
   0x5   :  { %p273_p3 = por %p272_p2, %p271_p1 }
   0x7   :  { %p274_p4 = pnand %p273_p3, %p267_p0 }
   0x9   :  { %277 = shalt.err (!%p274_p4)
}
   0xa   :  { %s280_s13 = smov [#allocation2]  }
   0xb   :  { %19 = dma.vmem_to_smem %s17_s11, 16, %s280_s13, [#allocation3]  }
   0xc   :  { %278 = dma.done.wait [#allocation3], 16  }
   0xd   :  { %279 = vsyncadd [#allocation3], 4294967280 }
   0xe   :  { %23 = sfence }
   0xf   :  { %s50_s14 = sld [smem:[#allocation2]]  ;;  %s255_s15 = sld [smem:[#allocation2 + $0x1]]  ;;  %v304_v0 = vld [vmem:[%s505_s0 + $0x10] sm:$0xff]  ;;  %v321_v3 = vld [vmem:[%s505_s0] sm:$0xff]  ;;  %v336_v6 = vld [vmem:[%s505_s0 + $0x18] sm:$0xf] }
  0x10   :  { %s256_s16 = sld [smem:[#allocation2 + $0x2]]  ;;  %v309_v1 = vld [vmem:[%s505_s0 + $0x30] sm:$0xff]  ;;  %s311_s20 = sld [smem:[#allocation2 + $0x3]]  ;;  %v326_v4 = vld [vmem:[%s505_s0 + $0x20] sm:$0xff]  ;;  %v341_v8 = vld [vmem:[%s505_s0 + $0x38] sm:$0xf] }
  0x11   :  { %v316_v2 = vld [vmem:[%s505_s0 + $0x50] sm:$0xff]  ;;  %s258_s25 = sld [smem:[#allocation2 + $0x4]]  ;;  %s259_s26 = sld [smem:[#allocation2 + $0x5]]  ;;  %v331_v5 = vld [vmem:[%s505_s0 + $0x40] sm:$0xff]  ;;  %v346_v9 = vld [vmem:[%s505_s0 + $0x58] sm:$0xf] }
  0x12   :  { %v351_v10 = vld [vmem:[%s505_s0 + $0x8] sm:$0xff]  ;;  %s281_s17 = smov 1   ;;  %vm24_vm0 = vcmask 244736   ;;  %vm28_vm1 = vcmask 242688   ;;  %vm236_vm2 = vcmask 236552   ;;  %vm240_vm3 = vcmask 232456  }
  0x13   :  { %v358_v15 = vld [vmem:[%s505_s0 + $0x28] sm:$0xff] }
  0x14   :  { %v363_v16 = vld [vmem:[%s505_s0 + $0x48] sm:$0xff]  ;;  %s383_s0 = sld [smem:[#allocation2 + $0x6]] }
  0x15   :  { %v51_v7 = vstv %s50_s14  ;;  %v57_v12 = vstv %s255_s15  ;;  %s387_s15 = sld [smem:[#allocation2 + $0x7]] }
  0x16   :  { %v54_v11 = vmul.f32 %v51_v7, %v304_v0  ;;  %v67_v13 = vstv %s256_s16  ;;  %v52_v14 = vmul.f32 %v51_v7, %v321_v3  ;;  %v60_v17 = vmul.f32 %v57_v12, %v309_v1  ;;  %s389_s16 = sld [smem:[#allocation2 + $0x8]] }
  0x17   :  { %v70_v18 = vmul.f32 %v67_v13, %v316_v2  ;;  %v58_v19 = vmul.f32 %v57_v12, %v326_v4  ;;  %v68_v20 = vmul.f32 %v67_v13, %v331_v5  ;;  %v55_v21 = vmul.f32 %v51_v7, %v336_v6 }
  0x18   :  { %v61_v22 = vmul.f32 %v57_v12, %v341_v8  ;;  %v71_v23 = vmul.f32 %v67_v13, %v346_v9  ;;  %v53_v24 = vmul.f32 %v51_v7, %v351_v10  ;;  %v64_v25 = vadd.f32 %v60_v17, %v54_v11 }
  0x19   :  { %v62_v26 = vadd.f32 %v58_v19, %v52_v14  ;;  %v59_v27 = vmul.f32 %v57_v12, %v358_v15  ;;  %v69_v28 = vmul.f32 %v67_v13, %v363_v16  ;;  %v77_v30 = vstv %s311_s20 }
  0x1a   :  { %v65_v29 = vadd.f32 %v61_v22, %v55_v21  ;;  %v83_v31 = vstv %s258_s25  ;;  %v93_v32 = vstv %s259_s26  ;;  %v74_v33 = vadd.f32 %v70_v18, %v64_v25 }
  0x1b   :  { %v72_v34 = vadd.f32 %v68_v20, %v62_v26  ;;  %v63_v35 = vadd.f32 %v59_v27, %v53_v24  ;;  %v79_v36 = vmul.f32 %v77_v30, %v351_v10  ;;  %v85_v38 = vmul.f32 %v83_v31, %v358_v15 }
  0x1c   :  { %v75_v37 = vadd.f32 %v71_v23, %v65_v29  ;;  %v95_v39 = vmul.f32 %v93_v32, %v363_v16  ;;  %v78_v40 = vmul.f32 %v77_v30, %v321_v3  ;;  %v130_v41 = vadd.f32 3.0, %v74_v33 }
  0x1d   :  { %v128_v42 = vadd.f32 3.0, %v72_v34  ;;  %v73_v43 = vadd.f32 %v69_v28, %v63_v35  ;;  %v84_v44 = vmul.f32 %v83_v31, %v326_v4  ;;  %v89_v46 = vadd.f32 %v85_v38, %v79_v36 }
  0x1e   :  { %v131_v45 = vadd.f32 3.0, %v75_v37  ;;  %v94_v47 = vmul.f32 %v93_v32, %v331_v5  ;;  %v81_v48 = vmul.f32 %v77_v30, %v336_v6  ;;  %v142_v49 = vmax.f32 %v130_v41, 0.0 }
  0x1f   :  { %v140_v50 = vmax.f32 %v128_v42, 0.0  ;;  %v129_v51 = vadd.f32 3.0, %v73_v43  ;;  %v88_v52 = vadd.f32 %v84_v44, %v78_v40  ;;  %v99_v54 = vadd.f32 %v95_v39, %v89_v46 }
  0x20   :  { %v143_v53 = vmax.f32 %v131_v45, 0.0  ;;  %v87_v55 = vmul.f32 %v83_v31, %v341_v8  ;;  %v97_v56 = vmul.f32 %v93_v32, %v346_v9  ;;  %v154_v57 = vmin.f32 %v142_v49, 6.0 }
  0x21   :  { %v152_v58 = vmin.f32 %v140_v50, 6.0  ;;  %v141_v59 = vmax.f32 %v129_v51, 0.0  ;;  %v98_v60 = vadd.f32 %v94_v47, %v88_v52  ;;  %v133_v62 = vadd.f32 3.0, %v99_v54 }
  0x22   :  { %v155_v61 = vmin.f32 %v143_v53, 6.0  ;;  %v91_v63 = vadd.f32 %v87_v55, %v81_v48  ;;  %v80_v7 = vmul.f32 %v77_v30, %v304_v0  ;;  %v166_v11 = vmul.f32 %v154_v57, %v74_v33 }
  0x23   :  { %v164_v12 = vmul.f32 %v152_v58, %v72_v34  ;;  %v153_v13 = vmin.f32 %v141_v59, 6.0  ;;  %v132_v14 = vadd.f32 3.0, %v98_v60  ;;  %v145_v18 = vmax.f32 %v133_v62, 0.0 }
  0x24   :  { %v167_v17 = vmul.f32 %v155_v61, %v75_v37  ;;  %v101_v19 = vadd.f32 %v97_v56, %v91_v63  ;;  %v86_v20 = vmul.f32 %v83_v31, %v309_v1  ;;  %v178_v21 = vmul.f32 0.16666667, %v166_v11 }
  0x25   :  { %v176_v22 = vmul.f32 0.16666667, %v164_v12  ;;  %v165_v23 = vmul.f32 %v153_v13, %v73_v43  ;;  %v144_v24 = vmax.f32 %v132_v14, 0.0  ;;  %v157_v26 = vmin.f32 %v145_v18, 6.0 }
  0x26   :  { %v179_v25 = vmul.f32 0.16666667, %v167_v17  ;;  %v135_v27 = vadd.f32 3.0, %v101_v19  ;;  %v90_v28 = vadd.f32 %v86_v20, %v80_v7  ;;  %204 = vrot.lane.b32.xlu1 %v178_v21, %s281_s17  ;;  %v96_v33 = vmul.f32 %v93_v32, %v316_v2 }
  0x27   :  { %200 = vrot.lane.b32.xlu0 %v176_v22, %s281_s17  ;;  %v177_v29 = vmul.f32 0.16666667, %v165_v23  ;;  %v156_v30 = vmin.f32 %v144_v24, 6.0  ;;  %v103_v31 = vstv %s383_s0  ;;  %v169_v34 = vmul.f32 %v157_v26, %v99_v54 }
  0x28   :  { %v147_v35 = vmax.f32 %v135_v27, 0.0  ;;  %v105_v36 = vmul.f32 %v103_v31, %v351_v10  ;;  %v109_v37 = vstv %s387_s15  ;;  %v100_v39 = vadd.f32 %v96_v33, %v90_v28 }
  0x29   :  { %v168_v38 = vmul.f32 %v156_v30, %v98_v60  ;;  %v111_v40 = vmul.f32 %v109_v37, %v358_v15  ;;  %v119_v41 = vstv %s389_s16  ;;  %v181_v42 = vmul.f32 0.16666667, %v169_v34 }
  0x2a   :  { %v159_v43 = vmin.f32 %v147_v35, 6.0  ;;  %v121_v44 = vmul.f32 %v119_v41, %v363_v16  ;;  %v104_v45 = vmul.f32 %v103_v31, %v321_v3  ;;  %206 = vrot.lane.b32.xlu1 %v179_v25, %s281_s17  ;;  %v134_v46 = vadd.f32 3.0, %v100_v39 }
  0x2b   :  { %202 = vrot.lane.b32.xlu0 %v177_v29, %s281_s17  ;;  %v180_v32 = vmul.f32 0.16666667, %v168_v38  ;;  %v115_v47 = vadd.f32 %v111_v40, %v105_v36  ;;  %v110_v10 = vmul.f32 %v109_v37, %v326_v4  ;;  %v120_v49 = vmul.f32 %v119_v41, %v331_v5 }
  0x2c   :  { %v171_v48 = vmul.f32 %v159_v43, %v101_v19  ;;  %v107_v15 = vmul.f32 %v103_v31, %v336_v6  ;;  %v113_v50 = vmul.f32 %v109_v37, %v341_v8  ;;  %v146_v51 = vmax.f32 %v134_v46, 0.0 }
  0x2d   :  { %v125_v16 = vadd.f32 %v121_v44, %v115_v47  ;;  %v114_v52 = vadd.f32 %v110_v10, %v104_v45  ;;  %v123_v3 = vmul.f32 %v119_v41, %v346_v9  ;;  %v106_v55 = vmul.f32 %v103_v31, %v304_v0 }
  0x2e   :  { %v183_v53 = vmul.f32 0.16666667, %v171_v48  ;;  %v117_v54 = vadd.f32 %v113_v50, %v107_v15  ;;  %v112_v56 = vmul.f32 %v109_v37, %v309_v1  ;;  %210 = vrot.lane.b32.xlu1 %v181_v42, %s281_s17  ;;  %v158_v4 = vmin.f32 %v146_v51, 6.0 }
  0x2f   :  { %208 = vrot.lane.b32.xlu0 %v180_v32, %s281_s17  ;;  %v137_v5 = vadd.f32 3.0, %v125_v16  ;;  %v124_v6 = vadd.f32 %v120_v49, %v114_v52  ;;  %v122_v8 = vmul.f32 %v119_v41, %v316_v2  ;;  %v282_v61 = vmov 0.0  }
  0x30   :  { %v127_v57 = vadd.f32 %v123_v3, %v117_v54  ;;  %v116_v58 = vadd.f32 %v112_v56, %v106_v55  ;;  %v170_v59 = vmul.f32 %v158_v4, %v100_v39  ;;  %27 = vst.msk [vmem:[%s507_s2 + $0x10] sm:$0xff] %vm24_vm0, %v282_v61  ;;  %25 = vst.msk [vmem:[%s507_s2] sm:$0xff] %vm24_vm0, %v282_v61 }
  0x31   :  { %v149_v9 = vmax.f32 %v137_v5, 0.0  ;;  %v136_v60 = vadd.f32 3.0, %v124_v6  ;;  %26 = vst.msk [vmem:[%s507_s2 + $0x8] sm:$0xff] %vm24_vm0, %v282_v61  ;;  %30 = vst.msk [vmem:[%s507_s2 + $0x20] sm:$0xff] %vm24_vm0, %v282_v61 }
  0x32   :  { %31 = vst.msk [vmem:[%s507_s2 + $0x28] sm:$0xff] %vm24_vm0, %v282_v61  ;;  %32 = vst.msk [vmem:[%s507_s2 + $0x30] sm:$0xff] %vm24_vm0, %v282_v61  ;;  %v139_v0 = vadd.f32 3.0, %v127_v57  ;;  %v126_v1 = vadd.f32 %v122_v8, %v116_v58  ;;  %214 = vrot.lane.b32.xlu1 %v183_v53, %s281_s17  ;;  %v182_v2 = vmul.f32 0.16666667, %v170_v59 }
  0x33   :  { %34 = vst.msk [vmem:[%s507_s2 + $0x40] sm:$0xff] %vm24_vm0, %v282_v61  ;;  %35 = vst.msk [vmem:[%s507_s2 + $0x48] sm:$0xff] %vm24_vm0, %v282_v61  ;;  %v161_v62 = vmin.f32 %v149_v9, 6.0  ;;  %v148_v63 = vmax.f32 %v136_v60, 0.0 }
  0x34   :  { %36 = vst.msk [vmem:[%s507_s2 + $0x50] sm:$0xff] %vm24_vm0, %v282_v61  ;;  %v151_v7 = vmax.f32 %v139_v0, 0.0  ;;  %v138_v11 = vadd.f32 3.0, %v126_v1  ;;  %212 = vrot.lane.b32.xlu0 %v182_v2, %s281_s17 }
  0x35   :  { %29 = vst.msk [vmem:[%s507_s2 + $0x18] sm:$0x3f] %vm28_vm1, %v282_v61  ;;  %33 = vst.msk [vmem:[%s507_s2 + $0x38] sm:$0x3f] %vm28_vm1, %v282_v61  ;;  %v173_v12 = vmul.f32 %v161_v62, %v125_v16  ;;  %v160_v13 = vmin.f32 %v148_v63, 6.0 }
  0x36   :  { %37 = vst.msk [vmem:[%s507_s2 + $0x58] sm:$0x3f] %vm28_vm1, %v282_v61  ;;  %v163_v14 = vmin.f32 %v151_v7, 6.0  ;;  %v150_v17 = vmax.f32 %v138_v11, 0.0 }
  0x37   :  { %v185_v18 = vmul.f32 0.16666667, %v173_v12  ;;  %v172_v19 = vmul.f32 %v160_v13, %v124_v6 }
  0x38   :  { %v175_v20 = vmul.f32 %v163_v14, %v127_v57  ;;  %v162_v21 = vmin.f32 %v150_v17, 6.0 }
  0x39   :  { %218 = vrot.lane.b32.xlu1 %v185_v18, %s281_s17  ;;  %v184_v22 = vmul.f32 0.16666667, %v172_v19 }
  0x3a   :  { %v187_v23 = vmul.f32 0.16666667, %v175_v20  ;;  %v174_v24 = vmul.f32 %v162_v21, %v126_v1 }
  0x3b   :  { %216 = vrot.lane.b32.xlu0 %v184_v22, %s281_s17 }
  0x3c   :  { %v186_v25 = vmul.f32 0.16666667, %v174_v24 }
  0x3d   :  { %222 = vrot.lane.b32.xlu1 %v187_v23, %s281_s17 }
  0x3f   :  { %220 = vrot.lane.b32.xlu0 %v186_v25, %s281_s17 }
  0x98   :  { %v205_v26 = vpop.permute.xlu1 %204 }
  0x99   :  { %v201_v27 = vpop.permute.xlu0 %200  ;;  %239 = vst.msk [vmem:[%s507_s2 + $0x11] sm:$0xff] %vm236_vm2, %v205_v26 }
  0x9a   :  { %237 = vst.msk [vmem:[%s507_s2 + $0x1] sm:$0xff] %vm236_vm2, %v201_v27 }
  0x9c   :  { %v207_v28 = vpop.permute.xlu1 %206 }
  0x9d   :  { %v203_v29 = vpop.permute.xlu0 %202  ;;  %241 = vst.msk [vmem:[%s507_s2 + $0x19] sm:$0xf] %vm240_vm3, %v207_v28 }
  0x9e   :  { %238 = vst.msk [vmem:[%s507_s2 + $0x9] sm:$0xff] %vm236_vm2, %v203_v29 }
  0xa0   :  { %v211_v30 = vpop.permute.xlu1 %210 }
  0xa1   :  { %v209_v33 = vpop.permute.xlu0 %208  ;;  %243 = vst.msk [vmem:[%s507_s2 + $0x29] sm:$0xff] %vm236_vm2, %v211_v30 }
  0xa2   :  { %242 = vst.msk [vmem:[%s507_s2 + $0x21] sm:$0xff] %vm236_vm2, %v209_v33 }
  0xa4   :  { %v215_v31 = vpop.permute.xlu1 %214 }
  0xa5   :  { %245 = vst.msk [vmem:[%s507_s2 + $0x39] sm:$0xf] %vm240_vm3, %v215_v31 }
  0xa6   :  { %v213_v34 = vpop.permute.xlu0 %212 }
  0xa7   :  { %244 = vst.msk [vmem:[%s507_s2 + $0x31] sm:$0xff] %vm236_vm2, %v213_v34 }
  0xab   :  { %v219_v35 = vpop.permute.xlu1 %218 }
  0xac   :  { %247 = vst.msk [vmem:[%s507_s2 + $0x49] sm:$0xff] %vm236_vm2, %v219_v35 }
  0xad   :  { %v217_v36 = vpop.permute.xlu0 %216 }
  0xae   :  { %246 = vst.msk [vmem:[%s507_s2 + $0x41] sm:$0xff] %vm236_vm2, %v217_v36 }
  0xaf   :  { %v223_v37 = vpop.permute.xlu1 %222 }
  0xb0   :  { %249 = vst.msk [vmem:[%s507_s2 + $0x59] sm:$0xf] %vm240_vm3, %v223_v37 }
  0xb1   :  { %v221_v38 = vpop.permute.xlu0 %220 }
  0xb2   :  { %248 = vst.msk [vmem:[%s507_s2 + $0x51] sm:$0xff] %vm236_vm2, %v221_v38 }
  0xb3   :  { %254 = vsyncpa [#allocation3], 1 }

</bundles_post_ra>
